<compile_context>
chip_gen: v7x
topology: tpu7x:2x2x1
jax: 0.10.0
libtpu: 0.0.40
codegen_flags: <defaults>
</compile_context>

<pallas_src>
import functools

import jax
import jax.numpy as jnp
from jax.experimental import pallas as pl
from jax.experimental.pallas import tpu as pltpu


def _round_up(x, m):
    return ((x + m - 1) // m) * m


def _critic_kernel(s_ref, a_ref, w1s_ref, w1a_ref, b1_ref, w2_ref, b2_ref,
                   w3_ref, b3_ref, o_ref, *, compute_dtype):
    # s_ref: (TB, S)  a_ref: (TB, A)
    # w1s: (S, H1)  w1a: (A, H1)  b1: (1, H1)      [w* in compute_dtype]
    # w2:  (H1, H2)               b2: (1, H2)
    # w3:  (1, H2) f32            b3: (1,) f32 in SMEM
    # o_ref: (TB, 1) f32

    # --- Layer 1: fused concat via split weights (MXU, f32 accumulation) ---
    h1 = jnp.dot(s_ref[...].astype(compute_dtype), w1s_ref[...],
                 preferred_element_type=jnp.float32)
    h1 = h1 + jnp.dot(a_ref[...].astype(compute_dtype), w1a_ref[...],
                      preferred_element_type=jnp.float32)
    h1 = jnp.maximum(h1 + b1_ref[...], 0.0)          # bias + ReLU in f32 (VPU)

    # --- Layer 2 (MXU, f32 accumulation) ---
    h2 = jnp.dot(h1.astype(compute_dtype), w2_ref[...],
                 preferred_element_type=jnp.float32)
    h2 = jnp.maximum(h2 + b2_ref[...], 0.0)

    # --- Layer 3: out_features == 1 -> VPU multiply + lane reduce (XLU),
    #     avoids a 1/128-utilized N=1 MXU matmul.  Scalar bias from SMEM. ---
    out = jnp.sum(h2 * w3_ref[...], axis=-1, keepdims=True) + b3_ref[0]
    o_ref[...] = out.astype(o_ref.dtype)


def critic_forward(state, action, params, *, block_b=512,
                   compute_dtype=jnp.bfloat16):
    """state: (B, S), action: (B, A) -> (B, 1) float32."""
    w1, b1, w2, b2, w3, b3 = params
    B, S = state.shape
    _, A = action.shape
    H1 = w1.shape[1]
    H2 = w2.shape[1]

    # Split W1 so the concat happens inside the kernel; cast matmul weights to
    # the compute dtype once (biases / final-layer weights stay f32 for the VPU).
    w1_s = w1[:S].astype(compute_dtype)
    w1_a = w1[S:].astype(compute_dtype)
    w2_c = w2.astype(compute_dtype)
    b1_f = b1.reshape(1, H1).astype(jnp.float32)
    b2_f = b2.reshape(1, H2).astype(jnp.float32)
    w3_row = w3.reshape(1, H2).astype(jnp.float32)
    b3_s = b3.reshape(1).astype(jnp.float32)

    # Batch tiling: TB is a multiple of 8 (sublane rule); pad B up to the tile.
    tb = max(8, min(block_b, _round_up(B, 8)))
    b_pad = _round_up(B, tb)
    if b_pad != B:
        state = jnp.pad(state, ((0, b_pad - B), (0, 0)))
        action = jnp.pad(action, ((0, b_pad - B), (0, 0)))
    n_tiles = b_pad // tb

    grid_spec = pltpu.PrefetchScalarGridSpec(
        num_scalar_prefetch=0,
        grid=(n_tiles,),
        in_specs=[
            # Streamed activations (double-buffered across the batch grid).
            pl.BlockSpec((tb, S), lambda i: (i, 0)),
            pl.BlockSpec((tb, A), lambda i: (i, 0)),
            # Weights/biases: constant index_map -> stay VMEM-resident.
            pl.BlockSpec((S, H1), lambda i: (0, 0)),
            pl.BlockSpec((A, H1), lambda i: (0, 0)),
            pl.BlockSpec((1, H1), lambda i: (0, 0)),
            pl.BlockSpec((H1, H2), lambda i: (0, 0)),
            pl.BlockSpec((1, H2), lambda i: (0, 0)),
            pl.BlockSpec((1, H2), lambda i: (0, 0)),
            # Scalar output bias in SMEM (no padded VMEM vreg tile).
            pl.BlockSpec(memory_space=pltpu.MemorySpace.SMEM),
        ],
        out_specs=pl.BlockSpec((tb, 1), lambda i: (i, 0)),
    )

    flops = 2 * b_pad * (S * H1 + A * H1 + H1 * H2 + H2)
    bytes_accessed = (
        4 * b_pad * (S + A + 1)                                   # activations / output
        + 2 * (S * H1 + A * H1 + H1 * H2) + 4 * (H1 + H2 + H2 + 1)  # params
    )

    out = pl.pallas_call(
        functools.partial(_critic_kernel, compute_dtype=compute_dtype),
        out_shape=jax.ShapeDtypeStruct((b_pad, 1), jnp.float32),
        grid_spec=grid_spec,
        compiler_params=pltpu.CompilerParams(
            # Batch axis is embarrassingly parallel -> megacore sharding on v7x.
            dimension_semantics=("parallel",),
            # Plenty for TB<=2048 tiles on every generation (v7x: 64 MiB phys).
            vmem_limit_bytes=32 * 1024 * 1024,
        ),
        cost_estimate=pl.CostEstimate(
            flops=flops, transcendentals=0, bytes_accessed=bytes_accessed),
    )(state, action, w1_s, w1_a, b1_f, w2_c, b2_f, w3_row, b3_s)

    return out[:B]


def init_params(key, state_size, action_size, h1, h2):
    """Deterministic init mimicking PyTorch nn.Linear (uniform +-1/sqrt(fan_in)).
    Weights stored as (in_features, out_features): x @ W + b == PyTorch x @ W.T + b."""
    def linear(key, fan_in, fan_out):
        kw, kb = jax.random.split(key)
        bound = 1.0 / jnp.sqrt(jnp.float32(fan_in))
        w = jax.random.uniform(kw, (fan_in, fan_out), jnp.float32, -bound, bound)
        b = jax.random.uniform(kb, (1, fan_out), jnp.float32, -bound, bound)
        return w, b

    k1, k2, k3 = jax.random.split(key, 3)
    w1, b1 = linear(k1, state_size + action_size, h1)
    w2, b2 = linear(k2, h1, h2)
    w3, b3 = linear(k3, h2, 1)
    return (w1, b1, w2, b2, w3, b3)


if __name__ == "__main__":
    # Small, forward-consistent shapes.
    B = 8
    STATE_SIZE = 12
    ACTION_SIZE = 4
    H1 = 32
    H2 = 32

    key = jax.random.PRNGKey(0)
    k_params, k_state, k_action = jax.random.split(key, 3)

    params = init_params(k_params, STATE_SIZE, ACTION_SIZE, H1, H2)
    state = jax.random.normal(k_state, (B, STATE_SIZE), jnp.float32)
    action = jax.random.normal(k_action, (B, ACTION_SIZE), jnp.float32)

    out = critic_forward(state, action, params)
    out = jax.block_until_ready(out)
    assert out.shape == (B, 1)

    w1, b1, w2, b2, w3, b3 = params

    # Reference #1: same bf16-operand / f32-accumulate math as the kernel.
    cdt = jnp.bfloat16
    h1 = jnp.maximum(
        jnp.dot(state.astype(cdt), w1[:STATE_SIZE].astype(cdt),
                preferred_element_type=jnp.float32)
        + jnp.dot(action.astype(cdt), w1[STATE_SIZE:].astype(cdt),
                  preferred_element_type=jnp.float32) + b1, 0.0)
    h2 = jnp.maximum(
        jnp.dot(h1.astype(cdt), w2.astype(cdt),
                preferred_element_type=jnp.float32) + b2, 0.0)
    ref_bf16 = h2 @ w3 + b3
    assert jnp.allclose(out, ref_bf16, atol=1e-4, rtol=1e-4), (
        jnp.max(jnp.abs(out - ref_bf16)))

    # Reference #2: full-f32 PyTorch-equivalent forward (loose check; bf16
    # matmul operands introduce small, acceptable error for a critic head).
    x = jnp.concatenate([state, action], axis=-1)
    ref = jnp.maximum(x @ w1 + b1, 0.0)
    ref = jnp.maximum(ref @ w2 + b2, 0.0)
    ref = ref @ w3 + b3
    assert jnp.allclose(out, ref, atol=5e-2), jnp.max(jnp.abs(out - ref))

    print("KERNEL_OK")
</pallas_src>

<mosaic_0001>
module attributes {stable_mosaic.version = 11 : i64} {
  func.func @_critic_kernel(%arg0: i32, %arg1: memref<8x12xf32, #tpu.memory_space<vmem>>, %arg2: memref<8x4xf32, #tpu.memory_space<vmem>>, %arg3: memref<12x32xbf16, #tpu.memory_space<vmem>>, %arg4: memref<4x32xbf16, #tpu.memory_space<vmem>>, %arg5: memref<1x32xf32, #tpu.memory_space<vmem>>, %arg6: memref<32x32xbf16, #tpu.memory_space<vmem>>, %arg7: memref<1x32xf32, #tpu.memory_space<vmem>>, %arg8: memref<1x32xf32, #tpu.memory_space<vmem>>, %arg9: memref<1xf32, #tpu.memory_space<smem>>, %arg10: memref<8x1xf32, #tpu.memory_space<vmem>>) attributes {dimension_semantics = [#tpu.dimension_semantics<parallel>], iteration_bounds = array<i64: 1>, scalar_prefetch = 0 : i64, scratch_operands = 0 : i64, tpu.core_type = #tpu.core_type<tc>, window_params = [{transform_indices = @transform_0, window_bounds = array<i64: 8, 12>}, {transform_indices = @transform_1, window_bounds = array<i64: 8, 4>}, {pipeline_mode = #tpu.pipeline_mode<synchronous>, transform_indices = @transform_2, window_bounds = array<i64: 12, 32>}, {pipeline_mode = #tpu.pipeline_mode<synchronous>, transform_indices = @transform_3, window_bounds = array<i64: 4, 32>}, {pipeline_mode = #tpu.pipeline_mode<synchronous>, transform_indices = @transform_4, window_bounds = array<i64: 1, 32>}, {pipeline_mode = #tpu.pipeline_mode<synchronous>, transform_indices = @transform_5, window_bounds = array<i64: 32, 32>}, {pipeline_mode = #tpu.pipeline_mode<synchronous>, transform_indices = @transform_6, window_bounds = array<i64: 1, 32>}, {pipeline_mode = #tpu.pipeline_mode<synchronous>, transform_indices = @transform_7, window_bounds = array<i64: 1, 32>}, {transform_indices = @transform_8, window_bounds = array<i64: 1>}, {transform_indices = @transform_9, window_bounds = array<i64: 8, 1>}]} {
    %c0 = arith.constant 0 : index
    %c0_0 = arith.constant 0 : index
    %0 = vector.load %arg1[%c0, %c0_0] : memref<8x12xf32, #tpu.memory_space<vmem>>, vector<8x12xf32>
    %1 = arith.truncf %0 : vector<8x12xf32> to vector<8x12xbf16>
    %c0_1 = arith.constant 0 : index
    %c0_2 = arith.constant 0 : index
    %2 = vector.load %arg3[%c0_1, %c0_2] : memref<12x32xbf16, #tpu.memory_space<vmem>>, vector<12x32xbf16>
    %cst = arith.constant dense<0.000000e+00> : vector<8x32xf32>
    %3 = tpu.matmul %1, %2, %cst {dimension_numbers = #tpu.dot_dimension_numbers<[1], [0], [0], [1], [0, 0, 1, 1], [], []>} : vector<8x12xbf16>, vector<12x32xbf16>, vector<8x32xf32> -> vector<8x32xf32>
    %c0_3 = arith.constant 0 : index
    %c0_4 = arith.constant 0 : index
    %4 = vector.load %arg2[%c0_3, %c0_4] : memref<8x4xf32, #tpu.memory_space<vmem>>, vector<8x4xf32>
    %5 = arith.truncf %4 : vector<8x4xf32> to vector<8x4xbf16>
    %c0_5 = arith.constant 0 : index
    %c0_6 = arith.constant 0 : index
    %6 = vector.load %arg4[%c0_5, %c0_6] : memref<4x32xbf16, #tpu.memory_space<vmem>>, vector<4x32xbf16>
    %cst_7 = arith.constant dense<0.000000e+00> : vector<8x32xf32>
    %7 = tpu.matmul %5, %6, %cst_7 {dimension_numbers = #tpu.dot_dimension_numbers<[1], [0], [0], [1], [0, 0, 1, 1], [], []>} : vector<8x4xbf16>, vector<4x32xbf16>, vector<8x32xf32> -> vector<8x32xf32>
    %8 = arith.addf %3, %7 : vector<8x32xf32>
    %c0_8 = arith.constant 0 : index
    %c0_9 = arith.constant 0 : index
    %9 = vector.load %arg5[%c0_8, %c0_9] : memref<1x32xf32, #tpu.memory_space<vmem>>, vector<1x32xf32>
    %10 = vector.broadcast %9 : vector<1x32xf32> to vector<8x32xf32>
    %11 = arith.addf %8, %10 : vector<8x32xf32>
    %cst_10 = arith.constant 0.000000e+00 : f32
    %12 = vector.broadcast %cst_10 : f32 to vector<8x32xf32>
    %13 = arith.maximumf %11, %12 : vector<8x32xf32>
    %14 = arith.truncf %13 : vector<8x32xf32> to vector<8x32xbf16>
    %c0_11 = arith.constant 0 : index
    %c0_12 = arith.constant 0 : index
    %15 = vector.load %arg6[%c0_11, %c0_12] : memref<32x32xbf16, #tpu.memory_space<vmem>>, vector<32x32xbf16>
    %cst_13 = arith.constant dense<0.000000e+00> : vector<8x32xf32>
    %16 = tpu.matmul %14, %15, %cst_13 {dimension_numbers = #tpu.dot_dimension_numbers<[1], [0], [0], [1], [0, 0, 1, 1], [], []>} : vector<8x32xbf16>, vector<32x32xbf16>, vector<8x32xf32> -> vector<8x32xf32>
    %c0_14 = arith.constant 0 : index
    %c0_15 = arith.constant 0 : index
    %17 = vector.load %arg7[%c0_14, %c0_15] : memref<1x32xf32, #tpu.memory_space<vmem>>, vector<1x32xf32>
    %18 = vector.broadcast %17 : vector<1x32xf32> to vector<8x32xf32>
    %19 = arith.addf %16, %18 : vector<8x32xf32>
    %cst_16 = arith.constant 0.000000e+00 : f32
    %20 = vector.broadcast %cst_16 : f32 to vector<8x32xf32>
    %21 = arith.maximumf %19, %20 : vector<8x32xf32>
    %c0_17 = arith.constant 0 : index
    %c0_18 = arith.constant 0 : index
    %22 = vector.load %arg8[%c0_17, %c0_18] : memref<1x32xf32, #tpu.memory_space<vmem>>, vector<1x32xf32>
    %23 = vector.broadcast %22 : vector<1x32xf32> to vector<8x32xf32>
    %24 = arith.mulf %21, %23 : vector<8x32xf32>
    %cst_19 = arith.constant dense<0.000000e+00> : vector<8xf32>
    %25 = vector.multi_reduction <add>, %24, %cst_19 [1] : vector<8x32xf32> to vector<8xf32>
    %26 = vector.shape_cast %25 : vector<8xf32> to vector<8x1xf32>
    %c0_20 = arith.constant 0 : index
    %27 = memref.load %arg9[%c0_20] : memref<1xf32, #tpu.memory_space<smem>>
    %28 = vector.broadcast %27 : f32 to vector<8x1xf32>
    %29 = arith.addf %26, %28 : vector<8x1xf32>
    %c0_21 = arith.constant 0 : index
    %c0_22 = arith.constant 0 : index
    %30 = vector.load %arg10[%c0_21, %c0_22] : memref<8x1xf32, #tpu.memory_space<vmem>>, vector<8x1xf32>
    tpu.vector_store %arg10[%c0_21, %c0_22], %29 {strides = array<i32>} : memref<8x1xf32, #tpu.memory_space<vmem>>, vector<8x1xf32>,
    return
  }
  func.func @transform_0(%arg0: i32) -> (i32, i32) {
    %c0_i32 = arith.constant 0 : i32
    %c0_i32_0 = arith.constant 0 : i32
    return %arg0, %c0_i32 : i32, i32
  }
  func.func @transform_1(%arg0: i32) -> (i32, i32) {
    %c0_i32 = arith.constant 0 : i32
    %c0_i32_0 = arith.constant 0 : i32
    return %arg0, %c0_i32 : i32, i32
  }
  func.func @transform_2(%arg0: i32) -> (i32, i32) {
    %c0_i32 = arith.constant 0 : i32
    %c0_i32_0 = arith.constant 0 : i32
    %c0_i32_1 = arith.constant 0 : i32
    return %c0_i32, %c0_i32_0 : i32, i32
  }
  func.func @transform_3(%arg0: i32) -> (i32, i32) {
    %c0_i32 = arith.constant 0 : i32
    %c0_i32_0 = arith.constant 0 : i32
    %c0_i32_1 = arith.constant 0 : i32
    return %c0_i32, %c0_i32_0 : i32, i32
  }
  func.func @transform_4(%arg0: i32) -> (i32, i32) {
    %c0_i32 = arith.constant 0 : i32
    %c0_i32_0 = arith.constant 0 : i32
    %c0_i32_1 = arith.constant 0 : i32
    return %c0_i32, %c0_i32_0 : i32, i32
  }
  func.func @transform_5(%arg0: i32) -> (i32, i32) {
    %c0_i32 = arith.constant 0 : i32
    %c0_i32_0 = arith.constant 0 : i32
    %c0_i32_1 = arith.constant 0 : i32
    return %c0_i32, %c0_i32_0 : i32, i32
  }
  func.func @transform_6(%arg0: i32) -> (i32, i32) {
    %c0_i32 = arith.constant 0 : i32
    %c0_i32_0 = arith.constant 0 : i32
    %c0_i32_1 = arith.constant 0 : i32
    return %c0_i32, %c0_i32_0 : i32, i32
  }
  func.func @transform_7(%arg0: i32) -> (i32, i32) {
    %c0_i32 = arith.constant 0 : i32
    %c0_i32_0 = arith.constant 0 : i32
    %c0_i32_1 = arith.constant 0 : i32
    return %c0_i32, %c0_i32_0 : i32, i32
  }
  func.func @transform_8(%arg0: i32) -> i32 {
    %c0_i32 = arith.constant 0 : i32
    %c0_i32_0 = arith.constant 0 : i32
    return %c0_i32 : i32
  }
  func.func @transform_9(%arg0: i32) -> (i32, i32) {
    %c0_i32 = arith.constant 0 : i32
    %c0_i32_0 = arith.constant 0 : i32
    return %arg0, %c0_i32 : i32, i32
  }
}

</mosaic_0001>

<bundles_post_ra>
// kernel: tpu_custom_call.1
= control target key start
LH: loop header
LB: loop body
LE: loop exit
PB: predicated region body
PF: predicated region fallthrough
CT: control target
= control target key end

     0   :  { %15 = vsyncpa [#allocation4], 0  ;;  %s323_s30 = smov [#allocation3]   ;;  %s423_s0 = inlined_call_operand.vmem [shape: f32[8,12], index: 0, kind: input, shape index: {}]   ;;  %s424_s1 = inlined_call_operand.vmem [shape: f32[8,4], index: 1, kind: input, shape index: {}]   ;;  %s425_s2 = inlined_call_operand.hbm [shape: bf16[12,32], index: 2, kind: input, shape index: {}]   ;;  %s426_s3 = inlined_call_operand.vmem [shape: bf16[4,32], index: 3, kind: input, shape index: {}]   ;;  %s427_s4 = inlined_call_operand.vmem [shape: f32[1,32], index: 4, kind: input, shape index: {}]   ;;  %s428_s5 = inlined_call_operand.vmem [shape: bf16[32,32], index: 5, kind: input, shape index: {}]   ;;  %s429_s6 = inlined_call_operand.vmem [shape: f32[1,32], index: 6, kind: input, shape index: {}]   ;;  %s430_s7 = inlined_call_operand.vmem [shape: f32[1,32], index: 7, kind: input, shape index: {}]   ;;  %s431_s8 = inlined_call_operand.<no memory space> [shape: f32[1], index: 8, kind: input, shape index: {}]   ;;  %s432_s9 = inlined_call_operand.vmem [shape: f32[8,1], index: 9, kind: output, shape index: {}]  }
   0x1   :  { %s25_s10 = sshll.u32 %s323_s30, 4  ;;  %s299_s13 = scalar_lea.hbm %s425_s2, 128  ;;  %s26_s10 = int_to_ptr.vmem [resolvable:$true] %s25_s10 }
   0x2   :  { %p300_p0 = scmp.ne.s32.totalorder %s425_s2, %s299_s13  ;;  %p303_p1 = scmp.lt.u32.totalorder %s299_s13, %s425_s2 }
   0x4   :  { %p305_p2 = pnand %p303_p1, %p300_p0 }
   0x6   :  { %308 = shalt.err (!%p305_p2)
}
   0x7   :  { %s309_s18 = scalar_lea.vmem %s26_s10, 128  ;;  %p314_p4 = scmp.lt.s32.totalorder %s26_s10, %s26_s10 }
   0x8   :  { %p310_p3 = scmp.ne.s32.totalorder %s26_s10, %s309_s18  ;;  %p315_p5 = scmp.lt.s32.totalorder %s309_s18, %s309_s18 }
   0xa   :  { %p316_p6 = por %p315_p5, %p314_p4 }
   0xc   :  { %p317_p7 = pnand %p316_p6, %p310_p3 }
   0xe   :  { %320 = shalt.err (!%p317_p7)
}
   0xf   :  { %s324_s19 = smov 64   ;;  %s325_s20 = smov 4  }
  0x10   :  { %31 = dma.hbm_to_vmem [thread:$0]  %s425_s2, 128, %s26_s10, [#allocation4], %s324_s19, %s324_s19, %s325_s20  }
  0x11   :  { %321 = dma.done.wait [#allocation4], 128  }
  0x12   :  { %322 = vsyncadd [#allocation4], 4294967168  ;;  %v326_v0 = vmov 0.0   ;;  %vm327_vm0 = vmmov 0   ;;  %vm59_vm1 = vcmask 1041408   ;;  %vm112_vm2 = vcmask 1045504  }
  0x13   :  { %271 = vmatprep.subr.bf16.mxu0 %v326_v0  ;;  %277 = vmatprep.subr.bf16.mxu1 %v326_v0  ;;  %v54_v1 = vld [vmem:[%s426_s3] sm:$0x3]  ;;  %vm55_vm3 = vcmask 31744   ;;  %vm108_vm4 = vcmask 97280   ;;  %v298_v10 = vld [vmem:[%s428_s5 + $0x8] sm:$0xff]   ;;  %vm189_vm5 = vcmask 261120   ;;  %v246_v34 = vstv %s431_s8 }
  0x14   :  { %273 = vmatprep.mubr.msk.bf16.mxu0 %vm327_vm0, %v326_v0  ;;  %279 = vmatprep.mubr.msk.bf16.mxu1 %vm327_vm0, %v326_v0  ;;  %v61_v2 = vsel %vm59_vm1, %v54_v1, 0  ;;  %v296_v3 = vld [vmem:[#allocation3] sm:$0x3f]   ;;  %vm248_vm6 = vcmask 7168  }
  0x15   :  { %v52_v4 = vld [vmem:[%s424_s1] sm:$0xff]  ;;  %272 = vmatpush3.bf16.msra.mxu0 %v61_v2  ;;  %v114_v7 = vsel %vm112_vm2, %v296_v3, 0 }
  0x16   :  { %v48_v5 = vld [vmem:[%s423_s0] sm:$0xff]  ;;  %v53_v6 = vpack.c.bf16 %v52_v4, %v52_v4  ;;  %283 = vmatprep.subr.bf16.mxu0 %v326_v0  ;;  %278 = vmatpush3.bf16.msra.mxu1 %v114_v7 }
  0x17   :  { %v49_v8 = vpack.c.bf16 %v48_v5, %v48_v5  ;;  %v297_v9 = vld [vmem:[%s428_s5] sm:$0xff]  }
  0x18   :  { %274 = vmatmul.mubr.msk.bf16.vlgmr.msra.gmra.mrb[0].mxu0 %vm55_vm3, %v53_v6  ;;  %v258_v15 = vld [vmem:[%s427_s4] ss:$0 sm:$0xff] }
  0x19   :  { %287 = vmatprep.mubr.msk.bf16.mxu0 %vm327_vm0, %v326_v0  ;;  %280 = vmatmul.mubr.msk.bf16.vlgmr.msra.gmra.mrb[0].mxu1 %vm108_vm4, %v49_v8  ;;  %v259_v24 = vld [vmem:[%s429_s6] ss:$0 sm:$0xff] }
  0x1a   :  { %284 = vmatpush3.bf16.msra.mxu0 %v297_v9  ;;  %v263_v29 = vld [vmem:[%s430_s7] ss:$0 sm:$0xff] }
  0x1b   :  { %285 = vmatprep.subr.bf16.mxu0 %v326_v0 }
  0x1e   :  { %286 = vmatpush3.bf16.msra.mxu0 %v298_v10 }
  0xeb   :  { %v97_v11 = vpop.f32.mrb[0].mxu0 }
  0xec   :  { %v275_v12 = vpop.f32.mrb[1].mxu0  ;;  %v150_v14 = vpop.f32.mrb[0].mxu1 }
  0xed   :  { %v100_v13 = vpop.f32.mrb[2].mxu0  ;;  %v151_v16 = vadd.f32 %v150_v14, %v97_v11  ;;  %v281_v18 = vpop.f32.mrb[1].mxu1 }
  0xee   :  { %v276_v17 = vpop.f32.mrb[3].mxu0  ;;  %v153_v19 = vpop.f32.mrb[2].mxu1 }
  0xef   :  { %v163_v20 = vadd.f32 %v258_v15, %v151_v16  ;;  %v282_v21 = vpop.f32.mrb[3].mxu1 }
  0xf1   :  { %v164_v22 = vmax.f32 %v163_v20, 0.0 }
  0xf3   :  { %v165_v23 = vpack.c.bf16 %v164_v22, %v164_v22 }
  0xf5   :  { %288 = vmatmul.mubr.msk.bf16.vlgmr.msra.gmra.mrb[4].mxu0 %vm189_vm5, %v165_v23 }
 0x1c8   :  { %v227_v25 = vpop.f32.mrb[4].mxu0 }
 0x1c9   :  { %v228_v26 = vadd.f32 %v259_v24, %v227_v25  ;;  %v289_v27 = vpop.f32.mrb[5].mxu0 }
 0x1ca   :  { %v230_v28 = vpop.f32.mrb[6].mxu0 }
 0x1cb   :  { %v233_v30 = vmax.f32 %v228_v26, 0.0  ;;  %v290_v31 = vpop.f32.mrb[7].mxu0 }
 0x1cd   :  { %v241_v32 = vmul.f32 %v263_v29, %v233_v30 }
 0x1cf   :  { %v242_v33 = vsel %vm189_vm5, %v241_v32, 0.0 }
 0x1d0   :  { %243 = vadd.xlane.f32.xlu0 %v242_v33 }
 0x25d   :  { %v244_v35 = vpop.xlane.xlu0 %243 }
 0x25e   :  { %v247_v36 = vadd.f32 %v246_v34, %v244_v35 }
 0x260   :  { %249 = vst.msk [vmem:[%s432_s9] sm:$0xff] %vm248_vm6, %v247_v36 }
 0x261   :  { %254 = vsyncpa [#allocation4], 1 }

</bundles_post_ra>
